<compile_context>
chip_gen: v7x
topology: tpu7x:2x2x1
jax: 0.10.0
libtpu: 0.0.40
codegen_flags: <defaults>
</compile_context>

<pallas_src>
import functools

import jax
import jax.numpy as jnp
from jax.experimental import pallas as pl
from jax.experimental.pallas import tpu as pltpu


def _round_up(a, b):
    return -(-a // b) * b


# ---------------------------------------------------------------------------
# Pallas kernels (BN scale pre-folded into W; kernels only add bias)
# ---------------------------------------------------------------------------
def _mm_bias_kernel(x_ref, w_ref, b_ref, o_ref, *, relu):
    """out = (x @ w) + bias, optionally ReLU'd."""
    y = jnp.dot(x_ref[...], w_ref[...], preferred_element_type=jnp.float32)
    y = y + b_ref[...]
    if relu:
        y = jnp.maximum(y, 0.0)
    o_ref[...] = y.astype(o_ref.dtype)


def _mm_bias_add_relu_kernel(x_ref, w_ref, b_ref, r_ref, o_ref):
    """out = relu((x @ w) + bias + residual)   (identity shortcut)."""
    y = jnp.dot(x_ref[...], w_ref[...], preferred_element_type=jnp.float32)
    y = y + b_ref[...] + r_ref[...].astype(jnp.float32)
    o_ref[...] = jnp.maximum(y, 0.0).astype(o_ref.dtype)


def _mm_bias_proj_relu_kernel(x_ref, w_ref, b_ref, xs_ref, ws_ref, o_ref):
    """out = relu((x @ w) + (x_strided @ w_sc) + bias)  (fused 1x1 projection)."""
    y = jnp.dot(x_ref[...], w_ref[...], preferred_element_type=jnp.float32)
    y = y + jnp.dot(xs_ref[...], ws_ref[...], preferred_element_type=jnp.float32)
    y = y + b_ref[...]
    o_ref[...] = jnp.maximum(y, 0.0).astype(o_ref.dtype)


# ---------------------------------------------------------------------------
# Tiling helpers
# ---------------------------------------------------------------------------
def _pick_tm(M, tm_max=512):
    """Row tile: full-M single block when small, else a divisor of padded M."""
    if M <= tm_max:
        return M, M                       # block == full dim, no padding
    Mp = _round_up(M, 8)
    for tm in range(tm_max, 127, -8):     # multiple of 8, >= 128
        if Mp % tm == 0:
            return tm, Mp
    return tm_max, _round_up(M, tm_max)   # fallback: pad last tile


def _pick_tn(N, tn_max=256):
    """Output-channel tile: full-N when small, else 256/128 divisor."""
    if N <= tn_max:
        return N, N
    for tn in (tn_max, 128):
        if N % tn == 0:
            return tn, N
    return 128, _round_up(N, 128)


# ---------------------------------------------------------------------------
# Fused matmul + bias (+ residual add | + fused 1x1 projection) + ReLU
# ---------------------------------------------------------------------------
def fused_matmul_bn(x, w, bias, *, residual=None, proj=None, relu=False,
                    out_dtype=jnp.float32, tm_max=512, tn_max=256):
    """out = relu?( x @ w + bias [+ residual | + xs @ ws] ).

    x:(M,K) bf16, w:(K,N) bf16 (BN scale pre-folded), bias:(N,) f32,
    residual:(M,N) bf16, proj = (xs:(M,Ks) bf16, ws:(Ks,N) bf16).
    """
    M, K = x.shape
    Kw, N = w.shape
    assert Kw == K

    tm, Mp = _pick_tm(M, tm_max)
    tn, Np = _pick_tn(N, tn_max)

    def pad_rows(a):
        return a if a.shape[0] == Mp else jnp.pad(a, ((0, Mp - a.shape[0]), (0, 0)))

    def pad_cols(a):
        return a if a.shape[1] == Np else jnp.pad(a, ((0, 0), (0, Np - a.shape[1])))

    x = pad_rows(x)
    w = pad_cols(w)
    b2 = pad_cols(bias.reshape(1, N).astype(jnp.float32))

    in_specs = [
        pl.BlockSpec((tm, K), lambda i, j: (i, 0)),
        pl.BlockSpec((K, tn), lambda i, j: (0, j)),
        pl.BlockSpec((1, tn), lambda i, j: (0, j)),
    ]
    args = [x, w, b2]

    if residual is not None:
        r = pad_cols(pad_rows(residual))
        in_specs.append(pl.BlockSpec((tm, tn), lambda i, j: (i, j)))
        args.append(r)
        kernel = _mm_bias_add_relu_kernel
    elif proj is not None:
        xs, ws = proj
        Ks = xs.shape[1]
        xs = pad_rows(xs)
        ws = pad_cols(ws)
        in_specs += [pl.BlockSpec((tm, Ks), lambda i, j: (i, 0)),
                     pl.BlockSpec((Ks, tn), lambda i, j: (0, j))]
        args += [xs, ws]
        kernel = _mm_bias_proj_relu_kernel
    else:
        kernel = functools.partial(_mm_bias_kernel, relu=relu)

    out = pl.pallas_call(
        kernel,
        out_shape=jax.ShapeDtypeStruct((Mp, Np), out_dtype),
        grid_spec=pltpu.PrefetchScalarGridSpec(
            num_scalar_prefetch=0,
            grid=(Mp // tm, Np // tn),
            in_specs=in_specs,
            out_specs=pl.BlockSpec((tm, tn), lambda i, j: (i, j)),
        ),
        compiler_params=pltpu.CompilerParams(
            dimension_semantics=("parallel", "parallel"),
            vmem_limit_bytes=32 * 1024 * 1024,
        ),
    )(*args)

    if Mp != M or Np != N:
        out = out[:M, :N]
    return out


# ---------------------------------------------------------------------------
# Conv layers as im2col (no transpose copy) + fused Pallas matmul
# ---------------------------------------------------------------------------
def _im2col_3x3(x_nhwc, stride):
    """Patch matrix (M, 9*Cin) with K ordered (kh,kw)-major / cin-minor."""
    N, H, W, C = x_nhwc.shape
    Ho = (H + 2 - 3) // stride + 1
    Wo = (W + 2 - 3) // stride + 1
    xp = jnp.pad(x_nhwc, ((0, 0), (1, 1), (1, 1), (0, 0)))
    patches = [
        xp[:, kh:kh + (Ho - 1) * stride + 1:stride,
              kw:kw + (Wo - 1) * stride + 1:stride, :]
        for kh in range(3) for kw in range(3)
    ]
    p = jnp.stack(patches, axis=3)               # (N, Ho, Wo, 9, C)
    return p.reshape(N * Ho * Wo, 9 * C), Ho, Wo


def conv3x3_bn(x_nhwc, w_oihw, scale, bias, stride, relu,
               residual_flat=None, proj=None, out_dtype=jnp.float32):
    """3x3 conv (pad=1, bias=False) + BN affine (+ residual / fused 1x1 proj) (+ ReLU)."""
    N, H, W, Cin = x_nhwc.shape
    Cout = w_oihw.shape[0]
    cols, Ho, Wo = _im2col_3x3(x_nhwc.astype(jnp.bfloat16), stride)
    # weight in same K order, with BN scale folded into the output columns
    wmat = jnp.transpose(w_oihw, (2, 3, 1, 0)).reshape(9 * Cin, Cout)
    wmat = (wmat * scale[None, :]).astype(jnp.bfloat16)
    out = fused_matmul_bn(cols, wmat, bias, residual=residual_flat, proj=proj,
                          relu=relu, out_dtype=out_dtype)
    return out.reshape(N, Ho, Wo, Cout)


# ---------------------------------------------------------------------------
# BasicBlock forward (NCHW in / NCHW out, like PyTorch)
# ---------------------------------------------------------------------------
def basic_block_forward(x_nchw, params, stride):
    x = jnp.transpose(x_nchw, (0, 2, 3, 1)).astype(jnp.bfloat16)  # NHWC bf16
    N, H, W, Cin = x.shape

    # conv1 + bn1 + relu -> bf16 intermediate
    h = conv3x3_bn(x, params["w1"], params["bn1_scale"], params["bn1_bias"],
                   stride, relu=True, out_dtype=jnp.bfloat16)

    if "w_sc" in params:
        # Fuse the 1x1 projection shortcut into conv2's kernel (second dot).
        xs = x[:, ::stride, ::stride, :]
        Ho, Wo = xs.shape[1], xs.shape[2]
        xs_flat = xs.reshape(N * Ho * Wo, Cin)
        Cout = params["w_sc"].shape[0]
        ws = params["w_sc"].reshape(Cout, Cin).T * params["sc_scale"][None, :]
        ws = ws.astype(jnp.bfloat16)
        out = conv3x3_bn(h, params["w2"], params["bn2_scale"],
                         params["bn2_bias"] + params["sc_bias"],
                         1, relu=True, proj=(xs_flat, ws),
                         out_dtype=jnp.float32)
    else:
        # Identity shortcut (stride == 1 and in_channels == out_channels).
        res = x.reshape(N * H * W, Cin)
        out = conv3x3_bn(h, params["w2"], params["bn2_scale"],
                         params["bn2_bias"], 1, relu=True,
                         residual_flat=res, out_dtype=jnp.float32)

    return jnp.transpose(out, (0, 3, 1, 2))  # -> NCHW f32


# ---------------------------------------------------------------------------
# Deterministic parameter construction (shapes from BasicBlock.__init__)
# ---------------------------------------------------------------------------
def make_params(key, in_channels, out_channels, stride, eps=1e-5):
    expansion = 1
    co = out_channels * expansion
    keys = jax.random.split(key, 16)

    def bn_fold(kg, kb, km, kv, c):
        gamma = 0.5 + jax.random.uniform(kg, (c,), jnp.float32)
        beta = 0.1 * jax.random.normal(kb, (c,), jnp.float32)
        rmean = 0.1 * jax.random.normal(km, (c,), jnp.float32)
        rvar = 0.5 + jax.random.uniform(kv, (c,), jnp.float32)
        scale = gamma / jnp.sqrt(rvar + eps)
        bias = beta - rmean * scale
        return scale, bias

    params = {}
    params["w1"] = 0.1 * jax.random.normal(
        keys[0], (out_channels, in_channels, 3, 3), jnp.float32)
    params["bn1_scale"], params["bn1_bias"] = bn_fold(
        keys[1], keys[2], keys[3], keys[4], out_channels)
    params["w2"] = 0.1 * jax.random.normal(
        keys[5], (co, out_channels, 3, 3), jnp.float32)
    params["bn2_scale"], params["bn2_bias"] = bn_fold(
        keys[6], keys[7], keys[8], keys[9], co)

    if stride != 1 or in_channels != co:
        params["w_sc"] = 0.1 * jax.random.normal(
            keys[10], (co, in_channels, 1, 1), jnp.float32)
        params["sc_scale"], params["sc_bias"] = bn_fold(
            keys[11], keys[12], keys[13], keys[14], co)
    return params


# ---------------------------------------------------------------------------
# Pure-JAX f32 reference (lax conv) for correctness check
# ---------------------------------------------------------------------------
def ref_forward(x, params, stride):
    def conv(x, w, s, pad):
        return jax.lax.conv_general_dilated(
            x, w, (s, s), [(pad, pad), (pad, pad)],
            dimension_numbers=("NCHW", "OIHW", "NCHW"))

    def bn(y, scale, bias):
        return y * scale.reshape(1, -1, 1, 1) + bias.reshape(1, -1, 1, 1)

    r = conv(x, params["w1"], stride, 1)
    r = jax.nn.relu(bn(r, params["bn1_scale"], params["bn1_bias"]))
    r = conv(r, params["w2"], 1, 1)
    r = bn(r, params["bn2_scale"], params["bn2_bias"])
    if "w_sc" in params:
        s = bn(conv(x, params["w_sc"], stride, 0),
               params["sc_scale"], params["sc_bias"])
    else:
        s = x
    return jax.nn.relu(r + s)


if __name__ == "__main__":
    key = jax.random.PRNGKey(0)
    kx1, kp1, kx2, kp2 = jax.random.split(key, 4)

    # bf16 MXU operands -> loosened tolerance vs the f32 lax reference.
    RTOL, ATOL = 1e-1, 5e-2

    # Config 1: projection shortcut (stride 2, channel change), fused 1x1 path.
    x1 = jax.random.normal(kx1, (2, 4, 16, 16), jnp.float32)
    p1 = make_params(kp1, 4, 8, 2)
    out1 = jax.block_until_ready(basic_block_forward(x1, p1, 2))
    ref1 = jax.block_until_ready(ref_forward(x1, p1, 2))
    assert out1.shape == ref1.shape, (out1.shape, ref1.shape)
    assert jnp.allclose(out1, ref1, rtol=RTOL, atol=ATOL), \
        float(jnp.max(jnp.abs(out1 - ref1)))

    # Config 2: identity shortcut (stride 1, same channels), residual-add path.
    x2 = jax.random.normal(kx2, (2, 8, 16, 16), jnp.float32)
    p2 = make_params(kp2, 8, 8, 1)
    out2 = jax.block_until_ready(basic_block_forward(x2, p2, 1))
    ref2 = jax.block_until_ready(ref_forward(x2, p2, 1))
    assert out2.shape == ref2.shape, (out2.shape, ref2.shape)
    assert jnp.allclose(out2, ref2, rtol=RTOL, atol=ATOL), \
        float(jnp.max(jnp.abs(out2 - ref2)))

    print("KERNEL_OK")
</pallas_src>

<mosaic_0001>
module attributes {stable_mosaic.version = 11 : i64} {
  func.func @_mm_bias_kernel(%arg0: i32, %arg1: i32, %arg2: memref<128x36xbf16, #tpu.memory_space<vmem>>, %arg3: memref<36x8xbf16, #tpu.memory_space<vmem>>, %arg4: memref<1x8xf32, #tpu.memory_space<vmem>>, %arg5: memref<128x8xbf16, #tpu.memory_space<vmem>>) attributes {dimension_semantics = [#tpu.dimension_semantics<parallel>, #tpu.dimension_semantics<parallel>], iteration_bounds = array<i64: 1, 1>, scalar_prefetch = 0 : i64, scratch_operands = 0 : i64, tpu.core_type = #tpu.core_type<tc>, window_params = [{transform_indices = @transform_0, window_bounds = array<i64: 128, 36>}, {transform_indices = @transform_1, window_bounds = array<i64: 36, 8>}, {transform_indices = @transform_2, window_bounds = array<i64: 1, 8>}, {transform_indices = @transform_3, window_bounds = array<i64: 128, 8>}]} {
    %c0 = arith.constant 0 : index
    %c0_0 = arith.constant 0 : index
    %0 = vector.load %arg2[%c0, %c0_0] : memref<128x36xbf16, #tpu.memory_space<vmem>>, vector<128x36xbf16>
    %c0_1 = arith.constant 0 : index
    %c0_2 = arith.constant 0 : index
    %1 = vector.load %arg3[%c0_1, %c0_2] : memref<36x8xbf16, #tpu.memory_space<vmem>>, vector<36x8xbf16>
    %cst = arith.constant dense<0.000000e+00> : vector<128x8xf32>
    %2 = tpu.matmul %0, %1, %cst {dimension_numbers = #tpu.dot_dimension_numbers<[1], [0], [0], [1], [0, 0, 1, 1], [], []>} : vector<128x36xbf16>, vector<36x8xbf16>, vector<128x8xf32> -> vector<128x8xf32>
    %c0_3 = arith.constant 0 : index
    %c0_4 = arith.constant 0 : index
    %3 = vector.load %arg4[%c0_3, %c0_4] : memref<1x8xf32, #tpu.memory_space<vmem>>, vector<1x8xf32>
    %4 = vector.broadcast %3 : vector<1x8xf32> to vector<128x8xf32>
    %5 = arith.addf %2, %4 : vector<128x8xf32>
    %cst_5 = arith.constant 0.000000e+00 : f32
    %6 = vector.broadcast %cst_5 : f32 to vector<128x8xf32>
    %7 = arith.maximumf %5, %6 : vector<128x8xf32>
    %8 = arith.truncf %7 : vector<128x8xf32> to vector<128x8xbf16>
    %c0_6 = arith.constant 0 : index
    %c0_7 = arith.constant 0 : index
    %9 = vector.load %arg5[%c0_6, %c0_7] : memref<128x8xbf16, #tpu.memory_space<vmem>>, vector<128x8xbf16>
    tpu.vector_store %arg5[%c0_6, %c0_7], %8 {strides = array<i32>} : memref<128x8xbf16, #tpu.memory_space<vmem>>, vector<128x8xbf16>,
    return
  }
  func.func @transform_0(%arg0: i32, %arg1: i32) -> (i32, i32) {
    %c0_i32 = arith.constant 0 : i32
    %c0_i32_0 = arith.constant 0 : i32
    return %arg0, %c0_i32 : i32, i32
  }
  func.func @transform_1(%arg0: i32, %arg1: i32) -> (i32, i32) {
    %c0_i32 = arith.constant 0 : i32
    %c0_i32_0 = arith.constant 0 : i32
    return %c0_i32, %arg1 : i32, i32
  }
  func.func @transform_2(%arg0: i32, %arg1: i32) -> (i32, i32) {
    %c0_i32 = arith.constant 0 : i32
    %c0_i32_0 = arith.constant 0 : i32
    return %c0_i32, %arg1 : i32, i32
  }
  func.func @transform_3(%arg0: i32, %arg1: i32) -> (i32, i32) {
    %c0_i32 = arith.constant 0 : i32
    return %arg0, %arg1 : i32, i32
  }
}

</mosaic_0001>

<bundles_post_ra>
// kernel: tpu_custom_call.1
= control target key start
LH: loop header
LB: loop body
LE: loop exit
PB: predicated region body
PF: predicated region fallthrough
CT: control target
= control target key end

     0   :  { %vm98_vm0 = vcmask 293888   ;;  %vm123_vm1 = vcmask 1041408   ;;  %vm304_vm2 = vcmask 60416   ;;  %s557_s1 = inlined_call_operand.vmem [shape: bf16[36,8], index: 1, kind: input, shape index: {}]   ;;  %s558_s0 = inlined_call_operand.vmem [shape: bf16[128,36], index: 0, kind: input, shape index: {}]   ;;  %s559_s2 = inlined_call_operand.vmem [shape: f32[1,8], index: 2, kind: input, shape index: {}]   ;;  %s560_s3 = inlined_call_operand.vmem [shape: bf16[128,8], index: 3, kind: output, shape index: {}]  }
   0x1   :  { %v418_v0 = vld [vmem:[%s557_s1] sm:$0xff]   ;;  %v419_v1 = vld [vmem:[%s557_s1 + $0x8] sm:$0xff]   ;;  %v420_v2 = vld [vmem:[%s557_s1 + $0x10] ss:$0 sps:$4 sm:$0x33]  }
   0x2   :  { %388 = vmatprep.subr.bf16.mxu0 %v418_v0  ;;  %410 = vmatprep.subr.bf16.mxu1 %v418_v0  ;;  %v421_v3 = vld [vmem:[%s558_s0] sm:$0xff]   ;;  %v125_v5 = vsel %vm123_vm1, %v420_v2, 0  ;;  %v423_v6 = vld [vmem:[%s558_s0 + $0x8] sm:$0xff]   ;;  %v425_v8 = vld [vmem:[%s558_s0 + $0x10] sm:$0xff]  }
   0x3   :  { %389 = vmatpush3.bf16.msra.mxu0 %v418_v0  ;;  %413 = vmatpush3.bf16.msra.mxu1 %v418_v0  ;;  %v422_v4 = vld [vmem:[%s558_s0 + $0x20] sm:$0xff]   ;;  %v424_v7 = vld [vmem:[%s558_s0 + $0x28] sm:$0xff]   ;;  %v426_v9 = vld [vmem:[%s558_s0 + $0x30] sm:$0xff]  }
   0x4   :  { %390 = vmatprep.subr.bf16.mxu0 %v419_v1  ;;  %411 = vmatprep.subr.bf16.mxu1 %v419_v1  ;;  %v427_v10 = vld [vmem:[%s558_s0 + $0x18] sm:$0xff]   ;;  %v325_v12 = vld [vmem:[%s559_s2] ss:$0 sm:$0xff] }
   0x5   :  { %394 = vmatprep.mubr.msk.bf16.mxu0 %vm98_vm0, %v421_v3  ;;  %402 = vmatprep.mubr.msk.bf16.mxu1 %vm98_vm0, %v422_v4  ;;  %v428_v11 = vld [vmem:[%s558_s0 + $0x38] sm:$0xff]  }
   0x7   :  { %391 = vmatpush3.bf16.msra.mxu0 %v419_v1  ;;  %414 = vmatpush3.bf16.msra.mxu1 %v419_v1 }
   0x8   :  { %416 = vmatprep.subr.msk.bf16.mxu0 %vm123_vm1, %v420_v2  ;;  %417 = vmatprep.subr.msk.bf16.mxu1 %vm123_vm1, %v420_v2 }
   0xb   :  { %393 = vmatpush3.bf16.msra.mxu0 %v125_v5  ;;  %415 = vmatpush3.bf16.msra.mxu1 %v125_v5 }
   0xe   :  { %395 = vmatmul.mubr.msk.bf16.vlgmr.msra.gmra.mrb[0].mxu0 %vm98_vm0, %v423_v6  ;;  %403 = vmatmul.mubr.msk.bf16.vlgmr.msra.gmra.mrb[0].mxu1 %vm98_vm0, %v424_v7 }
   0xf   :  { %398 = vmatprep.mubr.msk.bf16.mxu0 %vm98_vm0, %v425_v8  ;;  %406 = vmatprep.mubr.msk.bf16.mxu1 %vm98_vm0, %v426_v9 }
  0x16   :  { %399 = vmatmul.mubr.msk.bf16.gmra.mrb[4].mxu0 %vm98_vm0, %v427_v10  ;;  %407 = vmatmul.mubr.msk.bf16.gmra.mrb[4].mxu1 %vm98_vm0, %v428_v11 }
  0xe1   :  { %v396_v13 = vpop.f32.mrb[0].mxu0  ;;  %v404_v14 = vpop.f32.mrb[0].mxu1 }
  0xe2   :  { %v170_v15 = vadd.f32 %v396_v13, %v325_v12  ;;  %v202_v16 = vadd.f32 %v404_v14, %v325_v12  ;;  %v161_v17 = vpop.f32.mrb[1].mxu0  ;;  %v193_v18 = vpop.f32.mrb[1].mxu1 }
  0xe3   :  { %v162_v19 = vadd.f32 %v325_v12, %v161_v17  ;;  %v194_v20 = vadd.f32 %v325_v12, %v193_v18  ;;  %v397_v21 = vpop.f32.mrb[2].mxu0  ;;  %v405_v22 = vpop.f32.mrb[2].mxu1 }
  0xe4   :  { %v226_v23 = vmax.f32 %v170_v15, 0.0  ;;  %v234_v24 = vmax.f32 %v202_v16, 0.0  ;;  %v173_v25 = vadd.f32 %v397_v21, %v325_v12  ;;  %v205_v26 = vadd.f32 %v405_v22, %v325_v12  ;;  %v164_v27 = vpop.f32.mrb[3].mxu0  ;;  %v196_v28 = vpop.f32.mrb[3].mxu1 }
  0xe5   :  { %v224_v29 = vmax.f32 %v162_v19, 0.0  ;;  %v232_v30 = vmax.f32 %v194_v20, 0.0  ;;  %v165_v31 = vadd.f32 %v325_v12, %v164_v27  ;;  %v197_v32 = vadd.f32 %v325_v12, %v196_v28 }
  0xe6   :  { %v363_v33 = vpack.c.bf16 %v226_v23, %v226_v23  ;;  %v371_v34 = vpack.c.bf16 %v234_v24, %v234_v24  ;;  %v227_v35 = vmax.f32 %v173_v25, 0.0  ;;  %v235_v36 = vmax.f32 %v205_v26, 0.0 }
  0xe7   :  { %v361_v37 = vpack.c.bf16 %v224_v29, %v224_v29  ;;  %v369_v38 = vpack.c.bf16 %v232_v30, %v232_v30  ;;  %v225_v39 = vmax.f32 %v165_v31, 0.0  ;;  %v233_v40 = vmax.f32 %v197_v32, 0.0 }
  0xe8   :  { %307 = vst.msk [vmem:[%s560_s3 + $0x8] sm:$0xf] %vm304_vm2, %v363_v33  ;;  %315 = vst.msk [vmem:[%s560_s3 + $0x28] sm:$0xf] %vm304_vm2, %v371_v34  ;;  %v364_v41 = vpack.c.bf16 %v227_v35, %v227_v35  ;;  %v372_v42 = vpack.c.bf16 %v235_v36, %v235_v36 }
  0xe9   :  { %305 = vst.msk [vmem:[%s560_s3] sm:$0xf] %vm304_vm2, %v361_v37  ;;  %313 = vst.msk [vmem:[%s560_s3 + $0x20] sm:$0xf] %vm304_vm2, %v369_v38  ;;  %v362_v43 = vpack.c.bf16 %v225_v39, %v225_v39  ;;  %v370_v44 = vpack.c.bf16 %v233_v40, %v233_v40  ;;  %v400_v45 = vpop.f32.mrb[4].mxu0  ;;  %v408_v46 = vpop.f32.mrb[4].mxu1 }
  0xea   :  { %308 = vst.msk [vmem:[%s560_s3 + $0xc] sm:$0xf] %vm304_vm2, %v364_v41  ;;  %316 = vst.msk [vmem:[%s560_s3 + $0x2c] sm:$0xf] %vm304_vm2, %v372_v42  ;;  %v186_v47 = vadd.f32 %v400_v45, %v325_v12  ;;  %v218_v48 = vadd.f32 %v408_v46, %v325_v12  ;;  %v177_v49 = vpop.f32.mrb[5].mxu0  ;;  %v209_v50 = vpop.f32.mrb[5].mxu1 }
  0xeb   :  { %306 = vst.msk [vmem:[%s560_s3 + $0x4] sm:$0xf] %vm304_vm2, %v362_v43  ;;  %314 = vst.msk [vmem:[%s560_s3 + $0x24] sm:$0xf] %vm304_vm2, %v370_v44  ;;  %v178_v51 = vadd.f32 %v325_v12, %v177_v49  ;;  %v210_v52 = vadd.f32 %v325_v12, %v209_v50  ;;  %v401_v53 = vpop.f32.mrb[6].mxu0  ;;  %v409_v54 = vpop.f32.mrb[6].mxu1 }
  0xec   :  { %v230_v55 = vmax.f32 %v186_v47, 0.0  ;;  %v238_v56 = vmax.f32 %v218_v48, 0.0  ;;  %v189_v57 = vadd.f32 %v401_v53, %v325_v12  ;;  %v221_v58 = vadd.f32 %v409_v54, %v325_v12  ;;  %v180_v59 = vpop.f32.mrb[7].mxu0  ;;  %v212_v60 = vpop.f32.mrb[7].mxu1 }
  0xed   :  { %v228_v61 = vmax.f32 %v178_v51, 0.0  ;;  %v236_v62 = vmax.f32 %v210_v52, 0.0  ;;  %v181_v63 = vadd.f32 %v325_v12, %v180_v59  ;;  %v213_v0 = vadd.f32 %v325_v12, %v212_v60 }
  0xee   :  { %v367_v1 = vpack.c.bf16 %v230_v55, %v230_v55  ;;  %v375_v2 = vpack.c.bf16 %v238_v56, %v238_v56  ;;  %v231_v3 = vmax.f32 %v189_v57, 0.0  ;;  %v239_v4 = vmax.f32 %v221_v58, 0.0 }
  0xef   :  { %v365_v5 = vpack.c.bf16 %v228_v61, %v228_v61  ;;  %v373_v6 = vpack.c.bf16 %v236_v62, %v236_v62  ;;  %v229_v7 = vmax.f32 %v181_v63, 0.0  ;;  %v237_v8 = vmax.f32 %v213_v0, 0.0 }
  0xf0   :  { %311 = vst.msk [vmem:[%s560_s3 + $0x18] sm:$0xf] %vm304_vm2, %v367_v1  ;;  %319 = vst.msk [vmem:[%s560_s3 + $0x38] sm:$0xf] %vm304_vm2, %v375_v2  ;;  %v368_v9 = vpack.c.bf16 %v231_v3, %v231_v3  ;;  %v376_v10 = vpack.c.bf16 %v239_v4, %v239_v4 }
  0xf1   :  { %309 = vst.msk [vmem:[%s560_s3 + $0x10] sm:$0xf] %vm304_vm2, %v365_v5  ;;  %317 = vst.msk [vmem:[%s560_s3 + $0x30] sm:$0xf] %vm304_vm2, %v373_v6  ;;  %v366_v11 = vpack.c.bf16 %v229_v7, %v229_v7  ;;  %v374_v12 = vpack.c.bf16 %v237_v8, %v237_v8 }
  0xf2   :  { %312 = vst.msk [vmem:[%s560_s3 + $0x1c] sm:$0xf] %vm304_vm2, %v368_v9  ;;  %320 = vst.msk [vmem:[%s560_s3 + $0x3c] sm:$0xf] %vm304_vm2, %v376_v10 }
  0xf3   :  { %310 = vst.msk [vmem:[%s560_s3 + $0x14] sm:$0xf] %vm304_vm2, %v366_v11  ;;  %318 = vst.msk [vmem:[%s560_s3 + $0x34] sm:$0xf] %vm304_vm2, %v374_v12 }

</bundles_post_ra>
